<compile_context>
chip_gen: v5e
topology: v5e:2x2
jax: 0.10.0
libtpu: 0.0.40
codegen_flags: <defaults>
</compile_context>

<pallas_src>
import functools

import jax
import jax.numpy as jnp
from jax.experimental import pallas as pl
from jax.experimental.pallas import tpu as pltpu

LANE = 128     # vreg lane width: pad every feature dim to a multiple of this
SUBLANE = 8    # f32 sublane granule for the batch (row) dimension
MAX_TB = 512   # batch tile (rows) — measured sweet spot, tiny VMEM footprint


def _round_up(n, m):
    return ((n + m - 1) // m) * m


def autoencoder_kernel(x_ref,
                       w1_ref, b1_ref,
                       w2_ref, b2_ref,
                       w3_ref, b3_ref,
                       w4_ref, b4_ref,
                       o_ref):
    """Fused sigmoid(sigmoid(sigmoid(sigmoid(xW1+b1)W2+b2)W3+b3)W4+b4) on one batch tile."""
    x = x_ref[...].astype(jnp.float32)

    # encoder
    h = jnp.dot(x, w1_ref[...], preferred_element_type=jnp.float32) + b1_ref[...]
    h = jax.nn.sigmoid(h)
    h = jnp.dot(h, w2_ref[...], preferred_element_type=jnp.float32) + b2_ref[...]
    h = jax.nn.sigmoid(h)

    # decoder
    h = jnp.dot(h, w3_ref[...], preferred_element_type=jnp.float32) + b3_ref[...]
    h = jax.nn.sigmoid(h)
    h = jnp.dot(h, w4_ref[...], preferred_element_type=jnp.float32) + b4_ref[...]
    h = jax.nn.sigmoid(h)

    o_ref[...] = h.astype(o_ref.dtype)


def _pad_params(params, x_dim, h1, h2):
    """Zero-pad every feature dim up to a multiple of LANE (lane-dense layout).

    Padded weight rows/cols and bias lanes are zero, so pad lanes of an
    activation (which become sigmoid(0)=0.5) are multiplied by zero rows of
    the next layer and never contribute to real outputs.
    """
    xp, h1p, h2p = (_round_up(d, LANE) for d in (x_dim, h1, h2))

    def pad_w(w, rows, cols):
        return jnp.pad(w, ((0, rows - w.shape[0]), (0, cols - w.shape[1])))

    def pad_b(b, cols):
        return jnp.pad(b, ((0, 0), (0, cols - b.shape[1])))

    return dict(
        w1=pad_w(params["w1"], xp, h1p),  b1=pad_b(params["b1"], h1p),
        w2=pad_w(params["w2"], h1p, h2p), b2=pad_b(params["b2"], h2p),
        w3=pad_w(params["w3"], h2p, h1p), b3=pad_b(params["b3"], h1p),
        w4=pad_w(params["w4"], h1p, xp),  b4=pad_b(params["b4"], xp),
    )


@functools.partial(jax.jit, static_argnames=("max_tb",))
def autoencoder_forward(x, params, max_tb=MAX_TB):
    """x: (B, x_dim) float32. params: weights (in,out) and biases (1,out) (unpadded)."""
    B, x_dim = x.shape
    h1 = params["w1"].shape[1]
    h2 = params["w2"].shape[1]

    p = _pad_params(params, x_dim, h1, h2)
    xp, h1p = p["w1"].shape
    h2p = p["w2"].shape[1]

    # Batch tile: multiple of 8 sublanes, capped at max_tb rows.
    b_min = _round_up(B, SUBLANE)
    tb = max_tb if b_min >= max_tb else b_min
    bp = _round_up(B, tb)
    x_pad = jnp.pad(x, ((0, bp - B), (0, xp - x_dim)))

    grid = (bp // tb,)

    # Weights/biases: same block every step -> stay resident in VMEM.
    resident = lambda a: pl.BlockSpec(a.shape, lambda i: (0, 0))

    flops = 2 * bp * (xp * h1p + h1p * h2p + h2p * h1p + h1p * xp)
    transcendentals = bp * (h1p + h2p + h1p + xp)
    bytes_accessed = 4 * (2 * bp * xp
                          + xp * h1p + h1p * h2p + h2p * h1p + h1p * xp
                          + 2 * h1p + h2p + xp)

    out_pad = pl.pallas_call(
        autoencoder_kernel,
        out_shape=jax.ShapeDtypeStruct((bp, xp), x.dtype),
        grid=grid,
        in_specs=[pl.BlockSpec((tb, xp), lambda i: (i, 0)),
                  resident(p["w1"]), resident(p["b1"]),
                  resident(p["w2"]), resident(p["b2"]),
                  resident(p["w3"]), resident(p["b3"]),
                  resident(p["w4"]), resident(p["b4"])],
        out_specs=pl.BlockSpec((tb, xp), lambda i: (i, 0)),
        compiler_params=pltpu.CompilerParams(
            dimension_semantics=("parallel",)),
        cost_estimate=pl.CostEstimate(
            flops=flops,
            transcendentals=transcendentals,
            bytes_accessed=bytes_accessed),
    )(x_pad,
      p["w1"], p["b1"], p["w2"], p["b2"],
      p["w3"], p["b3"], p["w4"], p["b4"])

    # Slice off batch padding and lane padding (pad lanes hold sigmoid(0)=0.5).
    return out_pad[:B, :x_dim]


def init_params(key, x_dim, h_dim1, h_dim2):
    """Init mimicking PyTorch nn.Linear default (uniform +-1/sqrt(fan_in)).
    Weights stored as (in_features, out_features) = transpose of nn.Linear.weight."""
    dims = [(x_dim, h_dim1), (h_dim1, h_dim2), (h_dim2, h_dim1), (h_dim1, x_dim)]
    params = {}
    keys = jax.random.split(key, 2 * len(dims))
    for i, (fan_in, fan_out) in enumerate(dims):
        bound = 1.0 / jnp.sqrt(fan_in)
        params[f"w{i+1}"] = jax.random.uniform(
            keys[2 * i], (fan_in, fan_out), jnp.float32, -bound, bound)
        params[f"b{i+1}"] = jax.random.uniform(
            keys[2 * i + 1], (1, fan_out), jnp.float32, -bound, bound)
    return params


def reference_forward(x, params):
    h = jax.nn.sigmoid(x @ params["w1"] + params["b1"])
    h = jax.nn.sigmoid(h @ params["w2"] + params["b2"])
    h = jax.nn.sigmoid(h @ params["w3"] + params["b3"])
    h = jax.nn.sigmoid(h @ params["w4"] + params["b4"])
    return h


if __name__ == "__main__":
    # Small shapes consistent with the module's forward: x is (batch, x_dim).
    B, x_dim, h_dim1, h_dim2 = 8, 64, 32, 16

    key = jax.random.PRNGKey(0)
    k_x, k_p = jax.random.split(key)
    x = jax.random.normal(k_x, (B, x_dim), jnp.float32)
    params = init_params(k_p, x_dim, h_dim1, h_dim2)

    out = jax.block_until_ready(autoencoder_forward(x, params))
    ref = reference_forward(x, params)
    assert out.shape == (B, x_dim)
    assert jnp.allclose(out, ref, atol=1e-5, rtol=1e-5)

    # Also exercise the multi-step tiled/pipelined path (batch not a multiple
    # of the 512-row tile -> padding + 3-step "parallel" grid).
    B2 = 1064
    x2 = jax.random.normal(k_x, (B2, x_dim), jnp.float32)
    out2 = jax.block_until_ready(autoencoder_forward(x2, params))
    ref2 = reference_forward(x2, params)
    assert out2.shape == (B2, x_dim)
    assert jnp.allclose(out2, ref2, atol=1e-5, rtol=1e-5)

    print("KERNEL_OK")
</pallas_src>

<mosaic_0001>
module attributes {stable_mosaic.version = 11 : i64} {
  func.func @autoencoder_kernel(%arg0: i32, %arg1: memref<8x128xf32, #tpu.memory_space<vmem>>, %arg2: memref<128x128xf32, #tpu.memory_space<vmem>>, %arg3: memref<1x128xf32, #tpu.memory_space<vmem>>, %arg4: memref<128x128xf32, #tpu.memory_space<vmem>>, %arg5: memref<1x128xf32, #tpu.memory_space<vmem>>, %arg6: memref<128x128xf32, #tpu.memory_space<vmem>>, %arg7: memref<1x128xf32, #tpu.memory_space<vmem>>, %arg8: memref<128x128xf32, #tpu.memory_space<vmem>>, %arg9: memref<1x128xf32, #tpu.memory_space<vmem>>, %arg10: memref<8x128xf32, #tpu.memory_space<vmem>>) attributes {dimension_semantics = [#tpu.dimension_semantics<parallel>], iteration_bounds = array<i64: 1>, scalar_prefetch = 0 : i64, scratch_operands = 0 : i64, tpu.core_type = #tpu.core_type<tc>, window_params = [{transform_indices = @transform_0, window_bounds = array<i64: 8, 128>}, {pipeline_mode = #tpu.pipeline_mode<synchronous>, transform_indices = @transform_1, window_bounds = array<i64: 128, 128>}, {pipeline_mode = #tpu.pipeline_mode<synchronous>, transform_indices = @transform_2, window_bounds = array<i64: 1, 128>}, {pipeline_mode = #tpu.pipeline_mode<synchronous>, transform_indices = @transform_3, window_bounds = array<i64: 128, 128>}, {pipeline_mode = #tpu.pipeline_mode<synchronous>, transform_indices = @transform_4, window_bounds = array<i64: 1, 128>}, {pipeline_mode = #tpu.pipeline_mode<synchronous>, transform_indices = @transform_5, window_bounds = array<i64: 128, 128>}, {pipeline_mode = #tpu.pipeline_mode<synchronous>, transform_indices = @transform_6, window_bounds = array<i64: 1, 128>}, {pipeline_mode = #tpu.pipeline_mode<synchronous>, transform_indices = @transform_7, window_bounds = array<i64: 128, 128>}, {pipeline_mode = #tpu.pipeline_mode<synchronous>, transform_indices = @transform_8, window_bounds = array<i64: 1, 128>}, {transform_indices = @transform_9, window_bounds = array<i64: 8, 128>}]} {
    %c0 = arith.constant 0 : index
    %c0_0 = arith.constant 0 : index
    %0 = vector.load %arg1[%c0, %c0_0] : memref<8x128xf32, #tpu.memory_space<vmem>>, vector<8x128xf32>
    %c0_1 = arith.constant 0 : index
    %c0_2 = arith.constant 0 : index
    %1 = vector.load %arg2[%c0_1, %c0_2] : memref<128x128xf32, #tpu.memory_space<vmem>>, vector<128x128xf32>
    %cst = arith.constant dense<0.000000e+00> : vector<8x128xf32>
    %2 = tpu.matmul %0, %1, %cst {dimension_numbers = #tpu.dot_dimension_numbers<[1], [0], [0], [1], [0, 0, 1, 1], [], []>} : vector<8x128xf32>, vector<128x128xf32>, vector<8x128xf32> -> vector<8x128xf32>
    %c0_3 = arith.constant 0 : index
    %c0_4 = arith.constant 0 : index
    %3 = vector.load %arg3[%c0_3, %c0_4] : memref<1x128xf32, #tpu.memory_space<vmem>>, vector<1x128xf32>
    %4 = vector.broadcast %3 : vector<1x128xf32> to vector<8x128xf32>
    %5 = arith.addf %2, %4 : vector<8x128xf32>
    %6 = arith.negf %5 : vector<8x128xf32>
    %7 = math.exp %6 : vector<8x128xf32>
    %cst_5 = arith.constant 1.000000e+00 : f32
    %8 = vector.broadcast %cst_5 : f32 to vector<8x128xf32>
    %9 = arith.addf %8, %7 : vector<8x128xf32>
    %10 = arith.divf %8, %9 : vector<8x128xf32>
    %c0_6 = arith.constant 0 : index
    %c0_7 = arith.constant 0 : index
    %11 = vector.load %arg4[%c0_6, %c0_7] : memref<128x128xf32, #tpu.memory_space<vmem>>, vector<128x128xf32>
    %cst_8 = arith.constant dense<0.000000e+00> : vector<8x128xf32>
    %12 = tpu.matmul %10, %11, %cst_8 {dimension_numbers = #tpu.dot_dimension_numbers<[1], [0], [0], [1], [0, 0, 1, 1], [], []>} : vector<8x128xf32>, vector<128x128xf32>, vector<8x128xf32> -> vector<8x128xf32>
    %c0_9 = arith.constant 0 : index
    %c0_10 = arith.constant 0 : index
    %13 = vector.load %arg5[%c0_9, %c0_10] : memref<1x128xf32, #tpu.memory_space<vmem>>, vector<1x128xf32>
    %14 = vector.broadcast %13 : vector<1x128xf32> to vector<8x128xf32>
    %15 = arith.addf %12, %14 : vector<8x128xf32>
    %16 = arith.negf %15 : vector<8x128xf32>
    %17 = math.exp %16 : vector<8x128xf32>
    %cst_11 = arith.constant 1.000000e+00 : f32
    %18 = vector.broadcast %cst_11 : f32 to vector<8x128xf32>
    %19 = arith.addf %18, %17 : vector<8x128xf32>
    %20 = arith.divf %18, %19 : vector<8x128xf32>
    %c0_12 = arith.constant 0 : index
    %c0_13 = arith.constant 0 : index
    %21 = vector.load %arg6[%c0_12, %c0_13] : memref<128x128xf32, #tpu.memory_space<vmem>>, vector<128x128xf32>
    %cst_14 = arith.constant dense<0.000000e+00> : vector<8x128xf32>
    %22 = tpu.matmul %20, %21, %cst_14 {dimension_numbers = #tpu.dot_dimension_numbers<[1], [0], [0], [1], [0, 0, 1, 1], [], []>} : vector<8x128xf32>, vector<128x128xf32>, vector<8x128xf32> -> vector<8x128xf32>
    %c0_15 = arith.constant 0 : index
    %c0_16 = arith.constant 0 : index
    %23 = vector.load %arg7[%c0_15, %c0_16] : memref<1x128xf32, #tpu.memory_space<vmem>>, vector<1x128xf32>
    %24 = vector.broadcast %23 : vector<1x128xf32> to vector<8x128xf32>
    %25 = arith.addf %22, %24 : vector<8x128xf32>
    %26 = arith.negf %25 : vector<8x128xf32>
    %27 = math.exp %26 : vector<8x128xf32>
    %cst_17 = arith.constant 1.000000e+00 : f32
    %28 = vector.broadcast %cst_17 : f32 to vector<8x128xf32>
    %29 = arith.addf %28, %27 : vector<8x128xf32>
    %30 = arith.divf %28, %29 : vector<8x128xf32>
    %c0_18 = arith.constant 0 : index
    %c0_19 = arith.constant 0 : index
    %31 = vector.load %arg8[%c0_18, %c0_19] : memref<128x128xf32, #tpu.memory_space<vmem>>, vector<128x128xf32>
    %cst_20 = arith.constant dense<0.000000e+00> : vector<8x128xf32>
    %32 = tpu.matmul %30, %31, %cst_20 {dimension_numbers = #tpu.dot_dimension_numbers<[1], [0], [0], [1], [0, 0, 1, 1], [], []>} : vector<8x128xf32>, vector<128x128xf32>, vector<8x128xf32> -> vector<8x128xf32>
    %c0_21 = arith.constant 0 : index
    %c0_22 = arith.constant 0 : index
    %33 = vector.load %arg9[%c0_21, %c0_22] : memref<1x128xf32, #tpu.memory_space<vmem>>, vector<1x128xf32>
    %34 = vector.broadcast %33 : vector<1x128xf32> to vector<8x128xf32>
    %35 = arith.addf %32, %34 : vector<8x128xf32>
    %36 = arith.negf %35 : vector<8x128xf32>
    %37 = math.exp %36 : vector<8x128xf32>
    %cst_23 = arith.constant 1.000000e+00 : f32
    %38 = vector.broadcast %cst_23 : f32 to vector<8x128xf32>
    %39 = arith.addf %38, %37 : vector<8x128xf32>
    %40 = arith.divf %38, %39 : vector<8x128xf32>
    %c0_24 = arith.constant 0 : index
    %c0_25 = arith.constant 0 : index
    %41 = vector.load %arg10[%c0_24, %c0_25] : memref<8x128xf32, #tpu.memory_space<vmem>>, vector<8x128xf32>
    tpu.vector_store %arg10[%c0_24, %c0_25], %40 {strides = array<i32>} : memref<8x128xf32, #tpu.memory_space<vmem>>, vector<8x128xf32>,
    return
  }
  func.func @transform_0(%arg0: i32) -> (i32, i32) {
    %c0_i32 = arith.constant 0 : i32
    %c0_i32_0 = arith.constant 0 : i32
    return %arg0, %c0_i32 : i32, i32
  }
  func.func @transform_1(%arg0: i32) -> (i32, i32) {
    %c0_i32 = arith.constant 0 : i32
    %c0_i32_0 = arith.constant 0 : i32
    %c0_i32_1 = arith.constant 0 : i32
    return %c0_i32, %c0_i32_0 : i32, i32
  }
  func.func @transform_2(%arg0: i32) -> (i32, i32) {
    %c0_i32 = arith.constant 0 : i32
    %c0_i32_0 = arith.constant 0 : i32
    %c0_i32_1 = arith.constant 0 : i32
    return %c0_i32, %c0_i32_0 : i32, i32
  }
  func.func @transform_3(%arg0: i32) -> (i32, i32) {
    %c0_i32 = arith.constant 0 : i32
    %c0_i32_0 = arith.constant 0 : i32
    %c0_i32_1 = arith.constant 0 : i32
    return %c0_i32, %c0_i32_0 : i32, i32
  }
  func.func @transform_4(%arg0: i32) -> (i32, i32) {
    %c0_i32 = arith.constant 0 : i32
    %c0_i32_0 = arith.constant 0 : i32
    %c0_i32_1 = arith.constant 0 : i32
    return %c0_i32, %c0_i32_0 : i32, i32
  }
  func.func @transform_5(%arg0: i32) -> (i32, i32) {
    %c0_i32 = arith.constant 0 : i32
    %c0_i32_0 = arith.constant 0 : i32
    %c0_i32_1 = arith.constant 0 : i32
    return %c0_i32, %c0_i32_0 : i32, i32
  }
  func.func @transform_6(%arg0: i32) -> (i32, i32) {
    %c0_i32 = arith.constant 0 : i32
    %c0_i32_0 = arith.constant 0 : i32
    %c0_i32_1 = arith.constant 0 : i32
    return %c0_i32, %c0_i32_0 : i32, i32
  }
  func.func @transform_7(%arg0: i32) -> (i32, i32) {
    %c0_i32 = arith.constant 0 : i32
    %c0_i32_0 = arith.constant 0 : i32
    %c0_i32_1 = arith.constant 0 : i32
    return %c0_i32, %c0_i32_0 : i32, i32
  }
  func.func @transform_8(%arg0: i32) -> (i32, i32) {
    %c0_i32 = arith.constant 0 : i32
    %c0_i32_0 = arith.constant 0 : i32
    %c0_i32_1 = arith.constant 0 : i32
    return %c0_i32, %c0_i32_0 : i32, i32
  }
  func.func @transform_9(%arg0: i32) -> (i32, i32) {
    %c0_i32 = arith.constant 0 : i32
    %c0_i32_0 = arith.constant 0 : i32
    return %arg0, %c0_i32 : i32, i32
  }
}

</mosaic_0001>

<bundles_post_ra>
// kernel: autoencoder_forward.1
= control target key start
LH: loop header
LB: loop body
LE: loop exit
PB: predicated region body
PF: predicated region fallthrough
CT: control target
= control target key end

     0   :  { %s599_s0 = inlined_call_operand.vmem [shape: f32[8,128], index: 0, kind: input, shape index: {}]   ;;  %s600_s1 = inlined_call_operand.vmem [shape: f32[128,128], index: 1, kind: input, shape index: {}]   ;;  %s601_s2 = inlined_call_operand.vmem [shape: f32[1,128], index: 2, kind: input, shape index: {}]   ;;  %s602_s3 = inlined_call_operand.vmem [shape: f32[128,128], index: 3, kind: input, shape index: {}]   ;;  %s603_s4 = inlined_call_operand.vmem [shape: f32[1,128], index: 4, kind: input, shape index: {}]   ;;  %s604_s5 = inlined_call_operand.vmem [shape: f32[128,128], index: 5, kind: input, shape index: {}]   ;;  %s605_s6 = inlined_call_operand.vmem [shape: f32[1,128], index: 6, kind: input, shape index: {}]   ;;  %s606_s7 = inlined_call_operand.vmem [shape: f32[128,128], index: 7, kind: input, shape index: {}]   ;;  %s607_s8 = inlined_call_operand.vmem [shape: f32[1,128], index: 8, kind: input, shape index: {}]   ;;  %s608_s9 = inlined_call_operand.hbm [shape: f32[8,128], index: 9, kind: output, shape index: {}]  }
   0x1   :  { %v49_v0 = vld [vmem:[%s600_s1 + $0x78] sm:$0xff]  ;;  %v48_v1 = vld [vmem:[%s600_s1 + $0x70] sm:$0xff]  ;;  %v47_v2 = vld [vmem:[%s600_s1 + $0x68] sm:$0xff] }
   0x2   :  { %54 = vmatpush.msra.mxu0 %v49_v0  ;;  %v46_v3 = vld [vmem:[%s600_s1 + $0x60] sm:$0xff]  ;;  %v45_v4 = vld [vmem:[%s600_s1 + $0x58] sm:$0xff] }
   0x4   :  { %55 = vmatpush.msra.mxu0 %v48_v1 }
   0x6   :  { %56 = vmatpush.msra.mxu0 %v47_v2 }
   0x8   :  { %57 = vmatpush.msra.mxu0 %v46_v3 }
   0x9   :  { %14 = vsyncpa [#allocation3], 0  ;;  %v44_v5 = vld [vmem:[%s600_s1 + $0x50] sm:$0xff]  ;;  %v43_v6 = vld [vmem:[%s600_s1 + $0x48] sm:$0xff]  ;;  %s338_s22 = smov [#allocation2]  }
   0xa   :  { %58 = vmatpush.msra.mxu0 %v45_v4  ;;  %v42_v7 = vld [vmem:[%s600_s1 + $0x40] sm:$0xff]  ;;  %v41_v8 = vld [vmem:[%s600_s1 + $0x38] sm:$0xff]  ;;  %v40_v9 = vld [vmem:[%s600_s1 + $0x30] sm:$0xff]  ;;  %s276_s23 = sshll.u32 %s338_s22, 4  ;;  %s277_s23 = int_to_ptr.vmem [resolvable:$true] %s276_s23 }
   0xb   :  { %v39_v10 = vld [vmem:[%s600_s1 + $0x28] sm:$0xff]  ;;  %v38_v11 = vld [vmem:[%s600_s1 + $0x20] sm:$0xff]  ;;  %v37_v12 = vld [vmem:[%s600_s1 + $0x18] sm:$0xff] }
   0xc   :  { %59 = vmatpush.msra.mxu0 %v44_v5  ;;  %v36_v13 = vld [vmem:[%s600_s1 + $0x10] sm:$0xff]  ;;  %v35_v14 = vld [vmem:[%s600_s1 + $0x8] sm:$0xff]  ;;  %v34_v15 = vld [vmem:[%s600_s1] sm:$0xff] }
   0xd   :  { %v33_v16 = vld [vmem:[%s599_s0] sm:$0xff]  ;;  %v108_v17 = vld [vmem:[%s602_s3 + $0x78] sm:$0xff]  ;;  %v107_v18 = vld [vmem:[%s602_s3 + $0x70] sm:$0xff] }
   0xe   :  { %60 = vmatpush.msra.mxu0 %v43_v6  ;;  %113 = vmatpush.msra.mxu1 %v108_v17  ;;  %v106_v19 = vld [vmem:[%s602_s3 + $0x68] sm:$0xff]  ;;  %v105_v20 = vld [vmem:[%s602_s3 + $0x60] sm:$0xff]  ;;  %v104_v21 = vld [vmem:[%s602_s3 + $0x58] sm:$0xff] }
   0xf   :  { %v103_v22 = vld [vmem:[%s602_s3 + $0x50] sm:$0xff]  ;;  %v102_v23 = vld [vmem:[%s602_s3 + $0x48] sm:$0xff]  ;;  %v101_v24 = vld [vmem:[%s602_s3 + $0x40] sm:$0xff] }
  0x10   :  { %61 = vmatpush.msra.mxu0 %v42_v7  ;;  %114 = vmatpush.msra.mxu1 %v107_v18  ;;  %v100_v25 = vld [vmem:[%s602_s3 + $0x38] sm:$0xff]  ;;  %v99_v26 = vld [vmem:[%s602_s3 + $0x30] sm:$0xff]  ;;  %v98_v27 = vld [vmem:[%s602_s3 + $0x28] sm:$0xff] }
  0x11   :  { %v97_v28 = vld [vmem:[%s602_s3 + $0x20] sm:$0xff]  ;;  %v96_v29 = vld [vmem:[%s602_s3 + $0x18] sm:$0xff]  ;;  %v95_v30 = vld [vmem:[%s602_s3 + $0x10] sm:$0xff] }
  0x12   :  { %62 = vmatpush.msra.mxu0 %v41_v8  ;;  %115 = vmatpush.msra.mxu1 %v106_v19  ;;  %v94_v31 = vld [vmem:[%s602_s3 + $0x8] sm:$0xff]  ;;  %v93_v32 = vld [vmem:[%s602_s3] sm:$0xff]  ;;  %v167_v49 = vld [vmem:[%s604_s5 + $0x78] sm:$0xff] }
  0x13   :  { %v292_v33 = vld [vmem:[%s601_s2] ss:$0 sm:$0xff]  ;;  %172 = vmatpush.msra.mxu2 %v167_v49  ;;  %v166_v50 = vld [vmem:[%s604_s5 + $0x70] sm:$0xff]  ;;  %v165_v51 = vld [vmem:[%s604_s5 + $0x68] sm:$0xff] }
  0x14   :  { %63 = vmatpush.msra.mxu0 %v40_v9  ;;  %116 = vmatpush.msra.mxu1 %v105_v20  ;;  %v164_v52 = vld [vmem:[%s604_s5 + $0x60] sm:$0xff]  ;;  %v163_v53 = vld [vmem:[%s604_s5 + $0x58] sm:$0xff]  ;;  %v162_v54 = vld [vmem:[%s604_s5 + $0x50] sm:$0xff] }
  0x15   :  { %173 = vmatpush.msra.mxu2 %v166_v50  ;;  %v161_v55 = vld [vmem:[%s604_s5 + $0x48] sm:$0xff]  ;;  %v160_v56 = vld [vmem:[%s604_s5 + $0x40] sm:$0xff]  ;;  %v159_v57 = vld [vmem:[%s604_s5 + $0x38] sm:$0xff] }
  0x16   :  { %64 = vmatpush.msra.mxu0 %v39_v10  ;;  %117 = vmatpush.msra.mxu1 %v104_v21  ;;  %v158_v58 = vld [vmem:[%s604_s5 + $0x30] sm:$0xff]  ;;  %v157_v59 = vld [vmem:[%s604_s5 + $0x28] sm:$0xff]  ;;  %v156_v60 = vld [vmem:[%s604_s5 + $0x20] sm:$0xff] }
  0x17   :  { %174 = vmatpush.msra.mxu2 %v165_v51  ;;  %v155_v61 = vld [vmem:[%s604_s5 + $0x18] sm:$0xff]  ;;  %v154_v62 = vld [vmem:[%s604_s5 + $0x10] sm:$0xff]  ;;  %v153_v63 = vld [vmem:[%s604_s5 + $0x8] sm:$0xff] }
  0x18   :  { %65 = vmatpush.msra.mxu0 %v38_v11  ;;  %118 = vmatpush.msra.mxu1 %v103_v22  ;;  %v152_v0 = vld [vmem:[%s604_s5] sm:$0xff]  ;;  %v226_v17 = vld [vmem:[%s606_s7 + $0x78] sm:$0xff]  ;;  %v225_v18 = vld [vmem:[%s606_s7 + $0x70] sm:$0xff] }
  0x19   :  { %175 = vmatpush.msra.mxu2 %v164_v52  ;;  %v293_v1 = vld [vmem:[%s603_s4] ss:$0 sm:$0xff]  ;;  %231 = vmatpush.msra.mxu3 %v226_v17  ;;  %v224_v19 = vld [vmem:[%s606_s7 + $0x68] sm:$0xff]  ;;  %v222_v21 = vld [vmem:[%s606_s7 + $0x58] sm:$0xff] }
  0x1a   :  { %66 = vmatpush.msra.mxu0 %v37_v12  ;;  %119 = vmatpush.msra.mxu1 %v102_v23  ;;  %v223_v20 = vld [vmem:[%s606_s7 + $0x60] sm:$0xff]  ;;  %v221_v22 = vld [vmem:[%s606_s7 + $0x50] sm:$0xff]  ;;  %v220_v23 = vld [vmem:[%s606_s7 + $0x48] sm:$0xff] }
  0x1b   :  { %176 = vmatpush.msra.mxu2 %v163_v53  ;;  %232 = vmatpush.msra.mxu3 %v225_v18  ;;  %v295_v49 = vld [vmem:[%s607_s8] ss:$0 sm:$0xff]  ;;  %s278_s8 = sshll.u32 %s608_s9, 4  ;;  %s279_s8 = int_to_ptr.hbm [resolvable:$true] %s278_s8 }
  0x1c   :  { %67 = vmatpush.msra.mxu0 %v36_v13  ;;  %120 = vmatpush.msra.mxu1 %v101_v24  ;;  %v219_v24 = vld [vmem:[%s606_s7 + $0x40] sm:$0xff] }
  0x1d   :  { %177 = vmatpush.msra.mxu2 %v162_v54  ;;  %233 = vmatpush.msra.mxu3 %v224_v19 }
  0x1e   :  { %68 = vmatpush.msra.mxu0 %v35_v14  ;;  %121 = vmatpush.msra.mxu1 %v100_v25  ;;  %v218_v25 = vld [vmem:[%s606_s7 + $0x38] sm:$0xff] }
  0x1f   :  { %178 = vmatpush.msra.mxu2 %v161_v55  ;;  %234 = vmatpush.msra.mxu3 %v223_v20 }
  0x20   :  { %69 = vmatpush.msra.mxu0 %v34_v15  ;;  %122 = vmatpush.msra.mxu1 %v99_v26  ;;  %v217_v26 = vld [vmem:[%s606_s7 + $0x30] sm:$0xff] }
  0x21   :  { %70 = vmatmul.f32.vlgmr.msra.gmra.mxu0 %v33_v16  ;;  %179 = vmatpush.msra.mxu2 %v160_v56 }
  0x22   :  { %123 = vmatpush.msra.mxu1 %v98_v27  ;;  %235 = vmatpush.msra.mxu3 %v222_v21  ;;  %v216_v27 = vld [vmem:[%s606_s7 + $0x28] sm:$0xff] }
  0x23   :  { %180 = vmatpush.msra.mxu2 %v159_v57 }
  0x24   :  { %124 = vmatpush.msra.mxu1 %v97_v28  ;;  %236 = vmatpush.msra.mxu3 %v221_v22  ;;  %v215_v28 = vld [vmem:[%s606_s7 + $0x20] sm:$0xff] }
  0x25   :  { %181 = vmatpush.msra.mxu2 %v158_v58 }
  0x26   :  { %125 = vmatpush.msra.mxu1 %v96_v29  ;;  %237 = vmatpush.msra.mxu3 %v220_v23  ;;  %v214_v29 = vld [vmem:[%s606_s7 + $0x18] sm:$0xff] }
  0x27   :  { %182 = vmatpush.msra.mxu2 %v157_v59 }
  0x28   :  { %126 = vmatpush.msra.mxu1 %v95_v30  ;;  %238 = vmatpush.msra.mxu3 %v219_v24  ;;  %v213_v30 = vld [vmem:[%s606_s7 + $0x10] sm:$0xff] }
  0x29   :  { %183 = vmatpush.msra.mxu2 %v156_v60 }
  0x2a   :  { %127 = vmatpush.msra.mxu1 %v94_v31  ;;  %239 = vmatpush.msra.mxu3 %v218_v25  ;;  %v212_v31 = vld [vmem:[%s606_s7 + $0x8] sm:$0xff] }
  0x2b   :  { %184 = vmatpush.msra.mxu2 %v155_v61 }
  0x2c   :  { %128 = vmatpush.msra.mxu1 %v93_v32  ;;  %240 = vmatpush.msra.mxu3 %v217_v26  ;;  %v211_v32 = vld [vmem:[%s606_s7] sm:$0xff] }
  0x2d   :  { %185 = vmatpush.msra.mxu2 %v154_v62 }
  0x2e   :  { %241 = vmatpush.msra.mxu3 %v216_v27 }
  0x2f   :  { %186 = vmatpush.msra.mxu2 %v153_v63 }
  0x30   :  { %242 = vmatpush.msra.mxu3 %v215_v28 }
  0x31   :  { %187 = vmatpush.msra.mxu2 %v152_v0 }
  0x32   :  { %243 = vmatpush.msra.mxu3 %v214_v29 }
  0x34   :  { %244 = vmatpush.msra.mxu3 %v213_v30 }
  0x36   :  { %245 = vmatpush.msra.mxu3 %v212_v31 }
  0x38   :  { %246 = vmatpush.msra.mxu3 %v211_v32 }
  0x9e   :  { %v71_v34 = vpop.f32.mrf.mxu0 }
  0x9f   :  { %v72_v35 = vadd.f32 %v292_v33, %v71_v34  ;;  %v294_v33 = vld [vmem:[%s605_s6] ss:$0 sm:$0xff] }
  0xa1   :  { %v287_v36 = vmul.f32 -1.442695, %v72_v35 }
  0xa3   :  { %296 = vpow2.f32 %v287_v36 }
  0xa9   :  { %v297_v37 = vpop.eup %296 }
  0xaa   :  { %v77_v38 = vadd.f32 1.0, %v297_v37 }
  0xac   :  { %298 = vrcp.f32 %v77_v38  ;;  %v89_v42 = vand.u32 2147483648, %v77_v38  ;;  %v87_v44 = vand.u32 2147483647, %v77_v38  ;;  %vm83_vm1 = vweird.f32 %v77_v38 }
  0xae   :  { %v90_v46 = vor.u32 1.1754944e-38, %v89_v42  ;;  %vm88_vm3 = vcmp.eq.f32.partialorder %v87_v44, 8.507059e+37 }
  0xb2   :  { %v299_v39 = vpop.eup %298 }
  0xb3   :  { %v79_v40 = vmul.f32 %v299_v39, %v77_v38  ;;  %vm84_vm0 = vweird.f32 %v299_v39 }
  0xb4   :  { %vm85_vm2 = vmor %vm83_vm1, %vm84_vm0 }
  0xb5   :  { %v80_v41 = vsub.f32 1.0, %v79_v40 }
  0xb7   :  { %v81_v43 = vmul.f32 %v299_v39, %v80_v41 }
  0xb9   :  { %v82_v45 = vadd.f32 %v299_v39, %v81_v43 }
  0xbb   :  { %v86_v47 = vsel %vm85_vm2, %v299_v39, %v82_v45 }
  0xbc   :  { %v91_v48 = vsel %vm88_vm3, %v90_v46, %v86_v47 }
  0xbd   :  { %129 = vmatmul.f32.vlgmr.msra.gmra.mxu1 %v91_v48 }
 0x13a   :  { %v130_v2 = vpop.f32.mrf.mxu1 }
 0x13b   :  { %v131_v3 = vadd.f32 %v293_v1, %v130_v2 }
 0x13d   :  { %v288_v4 = vmul.f32 -1.442695, %v131_v3 }
 0x13f   :  { %300 = vpow2.f32 %v288_v4 }
 0x145   :  { %v301_v5 = vpop.eup %300 }
 0x146   :  { %v136_v6 = vadd.f32 1.0, %v301_v5 }
 0x148   :  { %302 = vrcp.f32 %v136_v6  ;;  %v148_v10 = vand.u32 2147483648, %v136_v6  ;;  %v146_v12 = vand.u32 2147483647, %v136_v6  ;;  %vm142_vm5 = vweird.f32 %v136_v6 }
 0x14a   :  { %v149_v14 = vor.u32 1.1754944e-38, %v148_v10  ;;  %vm147_vm7 = vcmp.eq.f32.partialorder %v146_v12, 8.507059e+37 }
 0x14e   :  { %v303_v7 = vpop.eup %302 }
 0x14f   :  { %v138_v8 = vmul.f32 %v303_v7, %v136_v6  ;;  %vm143_vm4 = vweird.f32 %v303_v7 }
 0x150   :  { %vm144_vm6 = vmor %vm142_vm5, %vm143_vm4 }
 0x151   :  { %v139_v9 = vsub.f32 1.0, %v138_v8 }
 0x153   :  { %v140_v11 = vmul.f32 %v303_v7, %v139_v9 }
 0x155   :  { %v141_v13 = vadd.f32 %v303_v7, %v140_v11 }
 0x157   :  { %v145_v15 = vsel %vm144_vm6, %v303_v7, %v141_v13 }
 0x158   :  { %v150_v16 = vsel %vm147_vm7, %v149_v14, %v145_v15 }
 0x159   :  { %188 = vmatmul.f32.vlgmr.msra.gmra.mxu2 %v150_v16 }
 0x1dc   :  { %v189_v34 = vpop.f32.mrf.mxu2 }
 0x1dd   :  { %v190_v35 = vadd.f32 %v294_v33, %v189_v34 }
 0x1df   :  { %v289_v36 = vmul.f32 -1.442695, %v190_v35 }
 0x1e1   :  { %304 = vpow2.f32 %v289_v36 }
 0x1e7   :  { %v305_v37 = vpop.eup %304 }
 0x1e8   :  { %v195_v38 = vadd.f32 1.0, %v305_v37 }
 0x1ea   :  { %306 = vrcp.f32 %v195_v38  ;;  %v207_v42 = vand.u32 2147483648, %v195_v38  ;;  %v205_v44 = vand.u32 2147483647, %v195_v38  ;;  %vm201_vm9 = vweird.f32 %v195_v38 }
 0x1ec   :  { %v208_v46 = vor.u32 1.1754944e-38, %v207_v42  ;;  %vm206_vm11 = vcmp.eq.f32.partialorder %v205_v44, 8.507059e+37 }
 0x1f0   :  { %v307_v39 = vpop.eup %306 }
 0x1f1   :  { %v197_v40 = vmul.f32 %v307_v39, %v195_v38  ;;  %vm202_vm8 = vweird.f32 %v307_v39 }
 0x1f2   :  { %vm203_vm10 = vmor %vm201_vm9, %vm202_vm8 }
 0x1f3   :  { %v198_v41 = vsub.f32 1.0, %v197_v40 }
 0x1f5   :  { %v199_v43 = vmul.f32 %v307_v39, %v198_v41 }
 0x1f7   :  { %v200_v45 = vadd.f32 %v307_v39, %v199_v43 }
 0x1f9   :  { %v204_v47 = vsel %vm203_vm10, %v307_v39, %v200_v45 }
 0x1fa   :  { %v209_v48 = vsel %vm206_vm11, %v208_v46, %v204_v47 }
 0x1fb   :  { %247 = vmatmul.f32.vlgmr.msra.gmra.mxu3 %v209_v48 }
 0x27e   :  { %v248_v50 = vpop.f32.mrf.mxu3 }
 0x27f   :  { %v249_v51 = vadd.f32 %v295_v49, %v248_v50 }
 0x281   :  { %v290_v52 = vmul.f32 -1.442695, %v249_v51 }
 0x283   :  { %308 = vpow2.f32 %v290_v52 }
 0x289   :  { %v309_v53 = vpop.eup %308 }
 0x28a   :  { %v254_v54 = vadd.f32 1.0, %v309_v53 }
 0x28c   :  { %310 = vrcp.f32 %v254_v54  ;;  %v266_v58 = vand.u32 2147483648, %v254_v54  ;;  %v264_v60 = vand.u32 2147483647, %v254_v54  ;;  %vm260_vm13 = vweird.f32 %v254_v54 }
 0x28e   :  { %v267_v62 = vor.u32 1.1754944e-38, %v266_v58  ;;  %vm265_vm15 = vcmp.eq.f32.partialorder %v264_v60, 8.507059e+37 }
 0x292   :  { %v311_v55 = vpop.eup %310 }
 0x293   :  { %v256_v56 = vmul.f32 %v311_v55, %v254_v54  ;;  %vm261_vm12 = vweird.f32 %v311_v55 }
 0x294   :  { %vm262_vm14 = vmor %vm260_vm13, %vm261_vm12 }
 0x295   :  { %v257_v57 = vsub.f32 1.0, %v256_v56 }
 0x297   :  { %v258_v59 = vmul.f32 %v311_v55, %v257_v57 }
 0x299   :  { %v259_v61 = vadd.f32 %v311_v55, %v258_v59 }
 0x29b   :  { %v263_v63 = vsel %vm262_vm14, %v311_v55, %v259_v61 }
 0x29c   :  { %v268_v0 = vsel %vm265_vm15, %v267_v62, %v263_v63 }
 0x29d   :  { %270 = vst [vmem:[#allocation2] sm:$0xff] %v268_v0 }
 0x29e   :  { %281 = dma.vmem_to_hbm [thread:$0]  %s277_s23, 128, %s279_s8, [#allocation3]  }
 0x29f   :  { %336 = dma.done.wait [#allocation3], 128  }
 0x2a0   :  { %337 = vsyncadd [#allocation3], 4294967168 }
 0x2a1   :  { %286 = vsyncpa [#allocation3], 1 }

</bundles_post_ra>
